<compile_context>
chip_gen: v7x
topology: tpu7x:2x2x1
jax: 0.10.0
libtpu: 0.0.40
codegen_flags: <defaults>
</compile_context>

<pallas_src>
import functools
import math

import jax
import jax.numpy as jnp
from jax.experimental import pallas as pl
from jax.experimental.pallas import tpu as pltpu

BN_EPS = 1e-5
LANE = 128
SUBLANE = 8
INV_SQRT2 = 1.0 / math.sqrt(2.0)


def _round_up(v, m):
    return ((v + m - 1) // m) * m


def _pad_to(a, axis, mult):
    pad = (-a.shape[axis]) % mult
    if pad == 0:
        return a
    widths = [(0, 0)] * a.ndim
    widths[axis] = (0, pad)
    return jnp.pad(a, widths)


# --------------------------------------------------------------------------- #
# Kernel
# --------------------------------------------------------------------------- #
def _mlp_kernel(x_ref, w1_ref, b1_ref, w2_ref, b2_ref, o_ref, acc_ref, *,
                approx_gelu):
    """One (row-tile, hidden-tile) grid step of fc1 -> BN(folded) -> GELU -> fc2."""
    h_idx = pl.program_id(1)

    @pl.when(h_idx == 0)
    def _init():
        acc_ref[...] = jnp.zeros_like(acc_ref)

    # fc1 (+ folded eval-mode BatchNorm).  x arrives as f32 and is cast to the
    # matmul dtype in-register (cheaper than a separate XLA pad/convert pass).
    x = x_ref[...].astype(w1_ref.dtype)
    h = jnp.dot(x, w1_ref[...], preferred_element_type=jnp.float32)
    h = h + b1_ref[...]                                  # (tile_n, tile_h) f32

    # GELU: exact erf form matches torch.nn.GELU's default.
    if approx_gelu:
        h = jax.nn.gelu(h, approximate=True)             # tanh form -> EUP slot
    else:
        h = 0.5 * h * (1.0 + jax.lax.erf(h * INV_SQRT2))

    # Dropout: identity in eval mode.
    # TODO(synk): training-mode dropout / BatchNorm not implemented (see header).

    # fc2 partial product for this hidden tile, accumulated in f32.
    acc_ref[...] += jnp.dot(h.astype(w2_ref.dtype), w2_ref[...],
                            preferred_element_type=jnp.float32)

    @pl.when(h_idx == pl.num_programs(1) - 1)
    def _finalize():
        o_ref[...] = (acc_ref[...] + b2_ref[...]).astype(o_ref.dtype)


# --------------------------------------------------------------------------- #
# One-time weight preparation (hoisted out of the per-call path)
# --------------------------------------------------------------------------- #
def prepare_params(params, *, use_bf16=True):
    """Fold eval-mode BatchNorm1d into fc1, pad hidden/output feature dims to
    multiples of 128 (lane-dense vregs, unmasked stores) and cast the matmul
    operands to bf16.  Call once; reuse the result for every forward call."""
    d_out = params["w2"].shape[1]

    scale = params["gamma"] * jax.lax.rsqrt(params["running_var"] + BN_EPS)  # (1, H)
    w1 = params["w1"] * scale                                                # column scale
    b1 = (params["b1"] - params["running_mean"]) * scale + params["beta"]
    w2 = params["w2"]
    b2 = params["b2"]

    w1 = _pad_to(w1, 1, LANE)                      # (Din, Hp)   Din left un-padded
    b1 = _pad_to(b1, 1, LANE)                      # (1,   Hp)
    w2 = _pad_to(_pad_to(w2, 0, LANE), 1, LANE)    # (Hp,  Doutp)
    b2 = _pad_to(b2, 1, LANE)                      # (1,   Doutp)

    mm_dtype = jnp.bfloat16 if use_bf16 else jnp.float32
    return {
        "w1": w1.astype(mm_dtype),
        "b1": b1.astype(jnp.float32),
        "w2": w2.astype(mm_dtype),
        "b2": b2.astype(jnp.float32),
        "d_out": d_out,
    }


# --------------------------------------------------------------------------- #
# VMEM budgeting and tile selection
# --------------------------------------------------------------------------- #
def _vmem_budget_bytes():
    """~85% of this generation's per-TensorCore VMEM (64 MiB v7x, 128 MiB v5e/v6e)."""
    cap = 64 << 20  # conservative fallback = v7x
    try:
        cap = int(pltpu.get_tpu_info().vmem_capacity_bytes)
    except Exception:
        pass
    return int(0.85 * cap)


def _tile_footprint(tile_n, tile_h, h_tiles, d_in, d_out_p, mm_bytes, out_bytes):
    """Rough per-step VMEM bytes: pipelined buffers + scratch + live temps."""
    wbufs = 1 if h_tiles == 1 else 2            # resident weights single-buffered
    d_in_l = _round_up(d_in, LANE)
    w = wbufs * (d_in * tile_h + tile_h * d_out_p) * mm_bytes
    b = wbufs * SUBLANE * tile_h * 4 + SUBLANE * d_out_p * 4
    xb = 2 * tile_n * d_in_l * 4                # f32 input, double-buffered
    ob = 2 * tile_n * d_out_p * out_bytes
    acc = tile_n * d_out_p * 4
    tmp = 2 * tile_n * tile_h * 4 + tile_n * d_in_l * mm_bytes
    return w + b + xb + ob + acc + tmp


def _select_tiling(n, d_in, d_hid_p, d_out_p, mm_bytes, out_bytes, budget,
                   tile_n_req=None, tile_h_req=None):
    h_units = d_hid_p // LANE

    # Hidden-dim split: smallest split whose weight tiles fit in ~half the
    # budget (single-buffered when resident, double-buffered when streamed).
    if tile_h_req is not None:
        tile_h = tile_h_req
    else:
        tile_h = LANE
        for s in range(1, h_units + 1):
            if h_units % s:
                continue
            th = (h_units // s) * LANE
            wbufs = 1 if s == 1 else 2
            w_bytes = wbufs * ((d_in * th + th * d_out_p) * mm_bytes
                               + SUBLANE * th * 4)
            if w_bytes <= budget // 2:
                tile_h = th
                break
    h_tiles = d_hid_p // max(tile_h, 1)

    # Row tile: largest MXU-friendly tile that fits the remaining VMEM.
    n8 = _round_up(max(n, 1), SUBLANE)
    if tile_n_req is not None:
        tile_n = max(SUBLANE, min(_round_up(tile_n_req, SUBLANE), n8))
    else:
        tile_n = SUBLANE
        for tn in (512, 384, 256, 128, 64, 32, 16, 8):
            tn = min(tn, n8)
            if _tile_footprint(tn, tile_h, h_tiles, d_in, d_out_p,
                               mm_bytes, out_bytes) <= budget:
                tile_n = tn
                break
        # v7x megacore: ensure >= 2 row tiles when the batch allows it, so both
        # TensorCores get work (no effect on single-TC v5e/v6e).
        if n > SUBLANE and -(-n // tile_n) < 2:
            tile_n = max(SUBLANE, min(tile_n, _round_up(-(-n // 2), SUBLANE)))
    return tile_n, tile_h


# --------------------------------------------------------------------------- #
# Forward
# --------------------------------------------------------------------------- #
def mlp_forward(x, prepped, *, tile_n=None, tile_h=None, approx_gelu=False,
                out_dtype=None, single_buffer_weights=True):
    """x: (N, in_features) float32.  `prepped` comes from prepare_params()."""
    n, d_in = x.shape
    w1, b1, w2, b2 = prepped["w1"], prepped["b1"], prepped["w2"], prepped["b2"]
    d_out = prepped["d_out"]
    if w1.shape[0] != d_in:
        raise ValueError("x feature dim does not match prepared weights")
    d_hid_p = w1.shape[1]
    d_out_p = w2.shape[1]
    out_dtype = x.dtype if out_dtype is None else out_dtype

    mm_bytes = jnp.dtype(w1.dtype).itemsize
    out_bytes = jnp.dtype(out_dtype).itemsize

    vmem_limit = _vmem_budget_bytes()
    tile_n, tile_h = _select_tiling(n, d_in, d_hid_p, d_out_p, mm_bytes,
                                    out_bytes, int(0.9 * vmem_limit),
                                    tile_n_req=tile_n, tile_h_req=tile_h)
    if (d_hid_p % tile_h) or (tile_h % LANE):
        raise ValueError("tile_h must be a multiple of 128 dividing the padded hidden dim")
    h_tiles = d_hid_p // tile_h
    row_tiles = -(-n // tile_n)
    grid = (row_tiles, h_tiles)

    kernel = functools.partial(_mlp_kernel, approx_gelu=approx_gelu)

    cost = pl.CostEstimate(
        flops=int(2 * n * d_hid_p * (d_in + d_out_p)),
        transcendentals=int(n * d_hid_p),
        bytes_accessed=int(x.size * x.dtype.itemsize
                           + (w1.size + w2.size) * mm_bytes
                           + (b1.size + b2.size) * 4
                           + n * d_out_p * out_bytes),
    )

    def bspec(shape, index_map, mode):
        if mode is None:
            return pl.BlockSpec(shape, index_map)
        return pl.BlockSpec(shape, index_map, pipeline_mode=mode)

    def run(single_buffer):
        # Weights/biases with constant index maps stay resident in VMEM
        # (single-buffered).  With a hidden split, w1/b1/w2 stream and use the
        # default double-buffering so DMA overlaps compute.
        resident = pl.Buffered(1) if (single_buffer and h_tiles == 1) else None
        const_b2 = pl.Buffered(1) if single_buffer else None
        in_specs = [
            bspec((tile_n, d_in), lambda i, h: (i, 0), None),          # x: row tiles
            bspec((d_in, tile_h), lambda i, h: (0, h), resident),      # w1
            bspec((1, tile_h), lambda i, h: (0, h), resident),         # b1 (BN folded)
            bspec((tile_h, d_out_p), lambda i, h: (h, 0), resident),   # w2
            bspec((1, d_out_p), lambda i, h: (0, 0), const_b2),        # b2
        ]
        return pl.pallas_call(
            kernel,
            out_shape=jax.ShapeDtypeStruct((n, d_out_p), out_dtype),
            grid=grid,
            in_specs=in_specs,
            out_specs=pl.BlockSpec((tile_n, d_out_p), lambda i, h: (i, 0)),
            scratch_shapes=[pltpu.VMEM((tile_n, d_out_p), jnp.float32)],
            compiler_params=pltpu.CompilerParams(
                dimension_semantics=("parallel", "arbitrary"),
                vmem_limit_bytes=vmem_limit,
            ),
            cost_estimate=cost,
        )(x, w1, b1, w2, b2)

    if single_buffer_weights:
        try:
            out_p = run(True)
        except Exception:
            # Fallback if this jax build rejects pipeline_mode=pl.Buffered(1):
            # default double-buffering (still correct, just more VMEM).
            out_p = run(False)
    else:
        out_p = run(False)

    # Slice off the padded output feature columns.
    return out_p[:, :d_out]


# --------------------------------------------------------------------------- #
# Parameter init + pure-JAX reference (for verification)
# --------------------------------------------------------------------------- #
def init_params(key, in_features, hidden_features, out_features):
    """Deterministic init mirroring PyTorch nn.Linear default (uniform +/- 1/sqrt(fan_in))."""
    k1, k2, k3, k4 = jax.random.split(key, 4)
    lim1 = 1.0 / math.sqrt(in_features)
    lim2 = 1.0 / math.sqrt(hidden_features)
    return {
        # stored pre-transposed relative to torch: (in, hidden) / (hidden, out)
        "w1": jax.random.uniform(k1, (in_features, hidden_features), jnp.float32, -lim1, lim1),
        "b1": jax.random.uniform(k2, (1, hidden_features), jnp.float32, -lim1, lim1),
        "w2": jax.random.uniform(k3, (hidden_features, out_features), jnp.float32, -lim2, lim2),
        "b2": jax.random.uniform(k4, (1, out_features), jnp.float32, -lim2, lim2),
        # BatchNorm1d defaults: gamma=1, beta=0, running_mean=0, running_var=1
        "gamma": jnp.ones((1, hidden_features), jnp.float32),
        "beta": jnp.zeros((1, hidden_features), jnp.float32),
        "running_mean": jnp.zeros((1, hidden_features), jnp.float32),
        "running_var": jnp.ones((1, hidden_features), jnp.float32),
    }


def mlp_reference(x, params):
    """Pure-JAX f32 reference for the eval-mode forward (matches the PyTorch module)."""
    h = x @ params["w1"] + params["b1"]
    h = (h - params["running_mean"]) * jax.lax.rsqrt(params["running_var"] + BN_EPS) \
        * params["gamma"] + params["beta"]
    h = 0.5 * h * (1.0 + jax.lax.erf(h * INV_SQRT2))
    return h @ params["w2"] + params["b2"]


if __name__ == "__main__":
    key = jax.random.PRNGKey(0)
    kx, kp, kx2, kp2 = jax.random.split(key, 4)

    # --- Config 1: tiny shapes straight from the module defaults -------------
    N, D_IN, D_HID, D_OUT = 8, 32, 64, 32
    x = jax.random.normal(kx, (N, D_IN), jnp.float32)
    params = init_params(kp, D_IN, D_HID, D_OUT)
    ref = mlp_reference(x, params)

    # f32-operand path: matches the reference up to BN-fold rounding.
    out_f32 = jax.block_until_ready(
        mlp_forward(x, prepare_params(params, use_bf16=False)))
    assert out_f32.shape == (N, D_OUT)
    assert jnp.allclose(out_f32, ref, atol=1e-4, rtol=1e-4), "f32 path mismatch vs reference"

    # bf16-operand / f32-accumulate path (the fast path): looser tolerance.
    out_bf16 = jax.block_until_ready(
        mlp_forward(x, prepare_params(params, use_bf16=True)))
    assert out_bf16.shape == (N, D_OUT)
    assert jnp.allclose(out_bf16, ref, atol=2e-2, rtol=2e-2), "bf16 path mismatch vs reference"

    # --- Config 2: partial last row tile + forced hidden-dim (K) split -------
    N2, D_IN2, D_HID2, D_OUT2 = 200, 128, 256, 64
    x2 = jax.random.normal(kx2, (N2, D_IN2), jnp.float32)
    params2 = init_params(kp2, D_IN2, D_HID2, D_OUT2)
    ref2 = mlp_reference(x2, params2)
    out2 = jax.block_until_ready(
        mlp_forward(x2, prepare_params(params2, use_bf16=False),
                    tile_n=128, tile_h=128))
    assert out2.shape == (N2, D_OUT2)
    assert jnp.allclose(out2, ref2, atol=1e-3, rtol=1e-3), "hidden-split path mismatch vs reference"

    print("KERNEL_OK")
</pallas_src>

<mosaic_0001>
module attributes {stable_mosaic.version = 11 : i64} {
  func.func @_mlp_kernel(%arg0: i32, %arg1: i32, %arg2: memref<8x32xf32, #tpu.memory_space<vmem>>, %arg3: memref<32x128xf32, #tpu.memory_space<vmem>>, %arg4: memref<1x128xf32, #tpu.memory_space<vmem>>, %arg5: memref<128x128xf32, #tpu.memory_space<vmem>>, %arg6: memref<1x128xf32, #tpu.memory_space<vmem>>, %arg7: memref<8x128xf32, #tpu.memory_space<vmem>>, %arg8: memref<8x128xf32, #tpu.memory_space<vmem>>) attributes {dimension_semantics = [#tpu.dimension_semantics<parallel>, #tpu.dimension_semantics<arbitrary>], iteration_bounds = array<i64: 1, 1>, scalar_prefetch = 0 : i64, scratch_operands = 1 : i64, tpu.core_type = #tpu.core_type<tc>, window_params = [{transform_indices = @transform_0, window_bounds = array<i64: 8, 32>}, {pipeline_mode = #tpu.pipeline_mode<synchronous>, transform_indices = @transform_1, window_bounds = array<i64: 32, 128>}, {pipeline_mode = #tpu.pipeline_mode<synchronous>, transform_indices = @transform_2, window_bounds = array<i64: 1, 128>}, {pipeline_mode = #tpu.pipeline_mode<synchronous>, transform_indices = @transform_3, window_bounds = array<i64: 128, 128>}, {pipeline_mode = #tpu.pipeline_mode<synchronous>, transform_indices = @transform_4, window_bounds = array<i64: 1, 128>}, {transform_indices = @transform_5, window_bounds = array<i64: 8, 128>}]} {
    %c0_i32 = arith.constant 0 : i32
    %0 = arith.cmpi eq, %arg1, %c0_i32 : i32
    %1 = arith.extui %0 : i1 to i32
    %c0_i32_0 = arith.constant 0 : i32
    %2 = arith.cmpi ne, %1, %c0_i32_0 : i32
    scf.if %2 {
      %cst_18 = arith.constant 0.000000e+00 : f32
      %25 = vector.broadcast %cst_18 : f32 to vector<8x128xf32>
      %c0_19 = arith.constant 0 : index
      %c0_20 = arith.constant 0 : index
      %26 = vector.load %arg8[%c0_19, %c0_20] : memref<8x128xf32, #tpu.memory_space<vmem>>, vector<8x128xf32>
      tpu.vector_store %arg8[%c0_19, %c0_20], %25 {strides = array<i32>} : memref<8x128xf32, #tpu.memory_space<vmem>>, vector<8x128xf32>,
    } else {
    }
    %c0 = arith.constant 0 : index
    %c0_1 = arith.constant 0 : index
    %3 = vector.load %arg2[%c0, %c0_1] : memref<8x32xf32, #tpu.memory_space<vmem>>, vector<8x32xf32>
    %c0_2 = arith.constant 0 : index
    %c0_3 = arith.constant 0 : index
    %4 = vector.load %arg3[%c0_2, %c0_3] : memref<32x128xf32, #tpu.memory_space<vmem>>, vector<32x128xf32>
    %cst = arith.constant dense<0.000000e+00> : vector<8x128xf32>
    %5 = tpu.matmul %3, %4, %cst {dimension_numbers = #tpu.dot_dimension_numbers<[1], [0], [0], [1], [0, 0, 1, 1], [], []>} : vector<8x32xf32>, vector<32x128xf32>, vector<8x128xf32> -> vector<8x128xf32>
    %c0_4 = arith.constant 0 : index
    %c0_5 = arith.constant 0 : index
    %6 = vector.load %arg4[%c0_4, %c0_5] : memref<1x128xf32, #tpu.memory_space<vmem>>, vector<1x128xf32>
    %7 = vector.broadcast %6 : vector<1x128xf32> to vector<8x128xf32>
    %8 = arith.addf %5, %7 : vector<8x128xf32>
    %cst_6 = arith.constant 5.000000e-01 : f32
    %9 = vector.broadcast %cst_6 : f32 to vector<8x128xf32>
    %10 = arith.mulf %9, %8 : vector<8x128xf32>
    %cst_7 = arith.constant 0.707106769 : f32
    %11 = vector.broadcast %cst_7 : f32 to vector<8x128xf32>
    %12 = arith.mulf %8, %11 : vector<8x128xf32>
    %13 = math.erf %12 : vector<8x128xf32>
    %cst_8 = arith.constant 1.000000e+00 : f32
    %14 = vector.broadcast %cst_8 : f32 to vector<8x128xf32>
    %15 = arith.addf %14, %13 : vector<8x128xf32>
    %16 = arith.mulf %10, %15 : vector<8x128xf32>
    %c0_9 = arith.constant 0 : index
    %c0_10 = arith.constant 0 : index
    %17 = vector.load %arg8[%c0_9, %c0_10] : memref<8x128xf32, #tpu.memory_space<vmem>>, vector<8x128xf32>
    %c0_11 = arith.constant 0 : index
    %c0_12 = arith.constant 0 : index
    %18 = vector.load %arg5[%c0_11, %c0_12] : memref<128x128xf32, #tpu.memory_space<vmem>>, vector<128x128xf32>
    %cst_13 = arith.constant dense<0.000000e+00> : vector<8x128xf32>
    %19 = tpu.matmul %16, %18, %cst_13 {dimension_numbers = #tpu.dot_dimension_numbers<[1], [0], [0], [1], [0, 0, 1, 1], [], []>} : vector<8x128xf32>, vector<128x128xf32>, vector<8x128xf32> -> vector<8x128xf32>
    %20 = arith.addf %17, %19 : vector<8x128xf32>
    %c0_14 = arith.constant 0 : index
    %c0_15 = arith.constant 0 : index
    %21 = vector.load %arg8[%c0_14, %c0_15] : memref<8x128xf32, #tpu.memory_space<vmem>>, vector<8x128xf32>
    tpu.vector_store %arg8[%c0_14, %c0_15], %20 {strides = array<i32>} : memref<8x128xf32, #tpu.memory_space<vmem>>, vector<8x128xf32>,
    %c0_i32_16 = arith.constant 0 : i32
    %22 = arith.cmpi eq, %arg1, %c0_i32_16 : i32
    %23 = arith.extui %22 : i1 to i32
    %c0_i32_17 = arith.constant 0 : i32
    %24 = arith.cmpi ne, %23, %c0_i32_17 : i32
    scf.if %24 {
      %c0_18 = arith.constant 0 : index
      %c0_19 = arith.constant 0 : index
      %25 = vector.load %arg8[%c0_18, %c0_19] : memref<8x128xf32, #tpu.memory_space<vmem>>, vector<8x128xf32>
      %c0_20 = arith.constant 0 : index
      %c0_21 = arith.constant 0 : index
      %26 = vector.load %arg6[%c0_20, %c0_21] : memref<1x128xf32, #tpu.memory_space<vmem>>, vector<1x128xf32>
      %27 = vector.broadcast %26 : vector<1x128xf32> to vector<8x128xf32>
      %28 = arith.addf %25, %27 : vector<8x128xf32>
      %c0_22 = arith.constant 0 : index
      %c0_23 = arith.constant 0 : index
      %29 = vector.load %arg7[%c0_22, %c0_23] : memref<8x128xf32, #tpu.memory_space<vmem>>, vector<8x128xf32>
      tpu.vector_store %arg7[%c0_22, %c0_23], %28 {strides = array<i32>} : memref<8x128xf32, #tpu.memory_space<vmem>>, vector<8x128xf32>,
    } else {
    }
    return
  }
  func.func @transform_0(%arg0: i32, %arg1: i32) -> (i32, i32) {
    %c0_i32 = arith.constant 0 : i32
    %c0_i32_0 = arith.constant 0 : i32
    return %arg0, %c0_i32 : i32, i32
  }
  func.func @transform_1(%arg0: i32, %arg1: i32) -> (i32, i32) {
    %c0_i32 = arith.constant 0 : i32
    %c0_i32_0 = arith.constant 0 : i32
    return %c0_i32, %arg1 : i32, i32
  }
  func.func @transform_2(%arg0: i32, %arg1: i32) -> (i32, i32) {
    %c0_i32 = arith.constant 0 : i32
    %c0_i32_0 = arith.constant 0 : i32
    return %c0_i32, %arg1 : i32, i32
  }
  func.func @transform_3(%arg0: i32, %arg1: i32) -> (i32, i32) {
    %c0_i32 = arith.constant 0 : i32
    %c0_i32_0 = arith.constant 0 : i32
    return %arg1, %c0_i32 : i32, i32
  }
  func.func @transform_4(%arg0: i32, %arg1: i32) -> (i32, i32) {
    %c0_i32 = arith.constant 0 : i32
    %c0_i32_0 = arith.constant 0 : i32
    %c0_i32_1 = arith.constant 0 : i32
    return %c0_i32, %c0_i32_0 : i32, i32
  }
  func.func @transform_5(%arg0: i32, %arg1: i32) -> (i32, i32) {
    %c0_i32 = arith.constant 0 : i32
    %c0_i32_0 = arith.constant 0 : i32
    return %arg0, %c0_i32 : i32, i32
  }
}

module attributes {stable_mosaic.version = 11 : i64} {
  func.func @_mlp_kernel(%arg0: i32, %arg1: i32, %arg2: memref<8x32xf32, #tpu.memory_space<vmem>>, %arg3: memref<32x128xf32, #tpu.memory_space<vmem>>, %arg4: memref<1x128xf32, #tpu.memory_space<vmem>>, %arg5: memref<128x128xf32, #tpu.memory_space<vmem>>, %arg6: memref<1x128xf32, #tpu.memory_space<vmem>>, %arg7: memref<8x128xf32, #tpu.memory_space<vmem>>, %arg8: memref<8x128xf32, #tpu.memory_space<vmem>>) attributes {dimension_semantics = [#tpu.dimension_semantics<parallel>, #tpu.dimension_semantics<arbitrary>], iteration_bounds = array<i64: 1, 1>, scalar_prefetch = 0 : i64, scratch_operands = 1 : i64, tpu.core_type = #tpu.core_type<tc>, window_params = [{transform_indices = @transform_0, window_bounds = array<i64: 8, 32>}, {transform_indices = @transform_1, window_bounds = array<i64: 32, 128>}, {transform_indices = @transform_2, window_bounds = array<i64: 1, 128>}, {transform_indices = @transform_3, window_bounds = array<i64: 128, 128>}, {pipeline_mode = #tpu.pipeline_mode<synchronous>, transform_indices = @transform_4, window_bounds = array<i64: 1, 128>}, {transform_indices = @transform_5, window_bounds = array<i64: 8, 128>}]} {
    %c0_i32 = arith.constant 0 : i32
    %0 = arith.cmpi eq, %arg1, %c0_i32 : i32
    %1 = arith.extui %0 : i1 to i32
    %c0_i32_0 = arith.constant 0 : i32
    %2 = arith.cmpi ne, %1, %c0_i32_0 : i32
    scf.if %2 {
      %cst_18 = arith.constant 0.000000e+00 : f32
      %25 = vector.broadcast %cst_18 : f32 to vector<8x128xf32>
      %c0_19 = arith.constant 0 : index
      %c0_20 = arith.constant 0 : index
      %26 = vector.load %arg8[%c0_19, %c0_20] : memref<8x128xf32, #tpu.memory_space<vmem>>, vector<8x128xf32>
      tpu.vector_store %arg8[%c0_19, %c0_20], %25 {strides = array<i32>} : memref<8x128xf32, #tpu.memory_space<vmem>>, vector<8x128xf32>,
    } else {
    }
    %c0 = arith.constant 0 : index
    %c0_1 = arith.constant 0 : index
    %3 = vector.load %arg2[%c0, %c0_1] : memref<8x32xf32, #tpu.memory_space<vmem>>, vector<8x32xf32>
    %c0_2 = arith.constant 0 : index
    %c0_3 = arith.constant 0 : index
    %4 = vector.load %arg3[%c0_2, %c0_3] : memref<32x128xf32, #tpu.memory_space<vmem>>, vector<32x128xf32>
    %cst = arith.constant dense<0.000000e+00> : vector<8x128xf32>
    %5 = tpu.matmul %3, %4, %cst {dimension_numbers = #tpu.dot_dimension_numbers<[1], [0], [0], [1], [0, 0, 1, 1], [], []>} : vector<8x32xf32>, vector<32x128xf32>, vector<8x128xf32> -> vector<8x128xf32>
    %c0_4 = arith.constant 0 : index
    %c0_5 = arith.constant 0 : index
    %6 = vector.load %arg4[%c0_4, %c0_5] : memref<1x128xf32, #tpu.memory_space<vmem>>, vector<1x128xf32>
    %7 = vector.broadcast %6 : vector<1x128xf32> to vector<8x128xf32>
    %8 = arith.addf %5, %7 : vector<8x128xf32>
    %cst_6 = arith.constant 5.000000e-01 : f32
    %9 = vector.broadcast %cst_6 : f32 to vector<8x128xf32>
    %10 = arith.mulf %9, %8 : vector<8x128xf32>
    %cst_7 = arith.constant 0.707106769 : f32
    %11 = vector.broadcast %cst_7 : f32 to vector<8x128xf32>
    %12 = arith.mulf %8, %11 : vector<8x128xf32>
    %13 = math.erf %12 : vector<8x128xf32>
    %cst_8 = arith.constant 1.000000e+00 : f32
    %14 = vector.broadcast %cst_8 : f32 to vector<8x128xf32>
    %15 = arith.addf %14, %13 : vector<8x128xf32>
    %16 = arith.mulf %10, %15 : vector<8x128xf32>
    %c0_9 = arith.constant 0 : index
    %c0_10 = arith.constant 0 : index
    %17 = vector.load %arg8[%c0_9, %c0_10] : memref<8x128xf32, #tpu.memory_space<vmem>>, vector<8x128xf32>
    %c0_11 = arith.constant 0 : index
    %c0_12 = arith.constant 0 : index
    %18 = vector.load %arg5[%c0_11, %c0_12] : memref<128x128xf32, #tpu.memory_space<vmem>>, vector<128x128xf32>
    %cst_13 = arith.constant dense<0.000000e+00> : vector<8x128xf32>
    %19 = tpu.matmul %16, %18, %cst_13 {dimension_numbers = #tpu.dot_dimension_numbers<[1], [0], [0], [1], [0, 0, 1, 1], [], []>} : vector<8x128xf32>, vector<128x128xf32>, vector<8x128xf32> -> vector<8x128xf32>
    %20 = arith.addf %17, %19 : vector<8x128xf32>
    %c0_14 = arith.constant 0 : index
    %c0_15 = arith.constant 0 : index
    %21 = vector.load %arg8[%c0_14, %c0_15] : memref<8x128xf32, #tpu.memory_space<vmem>>, vector<8x128xf32>
    tpu.vector_store %arg8[%c0_14, %c0_15], %20 {strides = array<i32>} : memref<8x128xf32, #tpu.memory_space<vmem>>, vector<8x128xf32>,
    %c0_i32_16 = arith.constant 0 : i32
    %22 = arith.cmpi eq, %arg1, %c0_i32_16 : i32
    %23 = arith.extui %22 : i1 to i32
    %c0_i32_17 = arith.constant 0 : i32
    %24 = arith.cmpi ne, %23, %c0_i32_17 : i32
    scf.if %24 {
      %c0_18 = arith.constant 0 : index
      %c0_19 = arith.constant 0 : index
      %25 = vector.load %arg8[%c0_18, %c0_19] : memref<8x128xf32, #tpu.memory_space<vmem>>, vector<8x128xf32>
      %c0_20 = arith.constant 0 : index
      %c0_21 = arith.constant 0 : index
      %26 = vector.load %arg6[%c0_20, %c0_21] : memref<1x128xf32, #tpu.memory_space<vmem>>, vector<1x128xf32>
      %27 = vector.broadcast %26 : vector<1x128xf32> to vector<8x128xf32>
      %28 = arith.addf %25, %27 : vector<8x128xf32>
      %c0_22 = arith.constant 0 : index
      %c0_23 = arith.constant 0 : index
      %29 = vector.load %arg7[%c0_22, %c0_23] : memref<8x128xf32, #tpu.memory_space<vmem>>, vector<8x128xf32>
      tpu.vector_store %arg7[%c0_22, %c0_23], %28 {strides = array<i32>} : memref<8x128xf32, #tpu.memory_space<vmem>>, vector<8x128xf32>,
    } else {
    }
    return
  }
  func.func @transform_0(%arg0: i32, %arg1: i32) -> (i32, i32) {
    %c0_i32 = arith.constant 0 : i32
    %c0_i32_0 = arith.constant 0 : i32
    return %arg0, %c0_i32 : i32, i32
  }
  func.func @transform_1(%arg0: i32, %arg1: i32) -> (i32, i32) {
    %c0_i32 = arith.constant 0 : i32
    %c0_i32_0 = arith.constant 0 : i32
    return %c0_i32, %arg1 : i32, i32
  }
  func.func @transform_2(%arg0: i32, %arg1: i32) -> (i32, i32) {
    %c0_i32 = arith.constant 0 : i32
    %c0_i32_0 = arith.constant 0 : i32
    return %c0_i32, %arg1 : i32, i32
  }
  func.func @transform_3(%arg0: i32, %arg1: i32) -> (i32, i32) {
    %c0_i32 = arith.constant 0 : i32
    %c0_i32_0 = arith.constant 0 : i32
    return %arg1, %c0_i32 : i32, i32
  }
  func.func @transform_4(%arg0: i32, %arg1: i32) -> (i32, i32) {
    %c0_i32 = arith.constant 0 : i32
    %c0_i32_0 = arith.constant 0 : i32
    %c0_i32_1 = arith.constant 0 : i32
    return %c0_i32, %c0_i32_0 : i32, i32
  }
  func.func @transform_5(%arg0: i32, %arg1: i32) -> (i32, i32) {
    %c0_i32 = arith.constant 0 : i32
    %c0_i32_0 = arith.constant 0 : i32
    return %arg0, %c0_i32 : i32, i32
  }
}

</mosaic_0001>

<bundles_post_ra>
// kernel: tpu_custom_call.1
= control target key start
LH: loop header
LB: loop body
LE: loop exit
PB: predicated region body
PF: predicated region fallthrough
CT: control target
= control target key end

     0   :  { %10 = vsyncpa [#allocation4], 0  ;;  %s579_s0 = inlined_call_operand.hbm [shape: f32[8,32], index: 0, kind: input, shape index: {}]   ;;  %s580_s1 = inlined_call_operand.hbm [shape: f32[32,128], index: 1, kind: input, shape index: {}]   ;;  %s581_s2 = inlined_call_operand.vmem [shape: f32[1,128], index: 2, kind: input, shape index: {}]   ;;  %s582_s3 = inlined_call_operand.hbm [shape: f32[128,128], index: 3, kind: input, shape index: {}]   ;;  %s583_s4 = inlined_call_operand.vmem [shape: f32[1,128], index: 4, kind: input, shape index: {}]   ;;  %s584_s5 = inlined_call_operand.hbm [shape: f32[8,128], index: 5, kind: output, shape index: {}]  }
   0x1   :  { %11 = vsyncpa [#allocation7], 0 }
   0x2   :  { %12 = vsyncpa [#allocation5], 0  ;;  %s480_s18 = smov [#allocation6]   ;;  %s386_s22 = scalar_lea.hbm %s580_s1, 512 }
   0x3   :  { %s28_s19 = sshll.u32 %s480_s18, 4  ;;  %p387_p0 = scmp.ne.s32.totalorder %s580_s1, %s386_s22  ;;  %s29_s19 = int_to_ptr.vmem [resolvable:$true] %s28_s19 }
   0x4   :  { %p390_p1 = scmp.lt.u32.totalorder %s386_s22, %s580_s1 }
   0x6   :  { %p392_p2 = pnand %p390_p1, %p387_p0 }
   0x8   :  { %395 = shalt.err (!%p392_p2)
}
   0x9   :  { %s396_s27 = scalar_lea.vmem %s29_s19, 512  ;;  %p401_p4 = scmp.lt.s32.totalorder %s29_s19, %s29_s19 }
   0xa   :  { %p397_p3 = scmp.ne.s32.totalorder %s29_s19, %s396_s27  ;;  %p402_p5 = scmp.lt.s32.totalorder %s396_s27, %s396_s27 }
   0xc   :  { %p403_p6 = por %p402_p5, %p401_p4 }
   0xe   :  { %p404_p7 = pnand %p403_p6, %p397_p3 }
  0x10   :  { %407 = shalt.err (!%p404_p7)
}
  0x11   :  { %s481_s28 = smov 128   ;;  %s482_s29 = smov 8  }
  0x12   :  { %34 = dma.hbm_to_vmem [thread:$0]  %s580_s1, 512, %s29_s19, [#allocation7], %s481_s28, %s481_s28, %s482_s29  }
  0x13   :  { %s483_s7 = smov [#allocation3]   ;;  %s484_s9 = smov [#allocation8]  }
  0x14   :  { %s19_s8 = sshll.u32 %s483_s7, 4  ;;  %s42_s10 = sshll.u32 %s484_s9, 4  ;;  %s20_s8 = int_to_ptr.vmem [resolvable:$true] %s19_s8  ;;  %s43_s10 = int_to_ptr.vmem [resolvable:$true] %s42_s10 }
  0x15   :  { %s408_s13 = scalar_lea.hbm %s579_s0, 128 }
  0x16   :  { %p409_p8 = scmp.ne.s32.totalorder %s579_s0, %s408_s13  ;;  %p412_p9 = scmp.lt.u32.totalorder %s408_s13, %s579_s0 }
  0x18   :  { %p414_p10 = pnand %p412_p9, %p409_p8 }
  0x1a   :  { %417 = shalt.err (!%p414_p10)
}
  0x1b   :  { %s418_s1 = scalar_lea.vmem %s20_s8, 128  ;;  %p423_p12 = scmp.lt.s32.totalorder %s20_s8, %s20_s8 }
  0x1c   :  { %p419_p11 = scmp.ne.s32.totalorder %s20_s8, %s418_s1  ;;  %p424_p13 = scmp.lt.s32.totalorder %s418_s1, %s418_s1 }
  0x1e   :  { %p425_p0 = por %p424_p13, %p423_p12 }
  0x20   :  { %p426_p1 = pnand %p425_p0, %p419_p11 }
  0x22   :  { %429 = shalt.err (!%p426_p1)
}
  0x23   :  { %22 = dma.hbm_to_vmem [thread:$0]  %s579_s0, 128, %s20_s8, [#allocation4]  }
  0x24   :  { %s430_s22 = scalar_lea.hbm %s582_s3, 2048 }
  0x25   :  { %p431_p2 = scmp.ne.s32.totalorder %s582_s3, %s430_s22  ;;  %p434_p3 = scmp.lt.u32.totalorder %s430_s22, %s582_s3 }
  0x27   :  { %p436_p4 = pnand %p434_p3, %p431_p2 }
  0x29   :  { %439 = shalt.err (!%p436_p4)
}
  0x2a   :  { %s440_s27 = scalar_lea.vmem %s43_s10, 2048  ;;  %p445_p6 = scmp.lt.s32.totalorder %s43_s10, %s43_s10 }
  0x2b   :  { %p441_p5 = scmp.ne.s32.totalorder %s43_s10, %s440_s27  ;;  %p446_p7 = scmp.lt.s32.totalorder %s440_s27, %s440_s27 }
  0x2d   :  { %p447_p8 = por %p446_p7, %p445_p6 }
  0x2f   :  { %p448_p9 = pnand %p447_p8, %p441_p5 }
  0x31   :  { %451 = shalt.err (!%p448_p9)
}
  0x32   :  { %48 = dma.hbm_to_vmem [thread:$0]  %s582_s3, 2048, %s43_s10, [#allocation7], %s481_s28, %s481_s28, %s482_s29  }
  0x33   :  { %474 = dma.done.wait [#allocation4], 128  }
  0x34   :  { %475 = vsyncadd [#allocation4], 4294967168 }
  0x35   :  { %476 = dma.done.wait [#allocation7], 2560  }
  0x36   :  { %477 = vsyncadd [#allocation7], 4294964736  ;;  %v485_v0 = vmov 0.0|0.0   ;;  %vm486_vm0 = vmmov 0   ;;  %v487_v1 = vmov 0.0   ;;  %v66_v2 = vld [vmem:[#allocation6] sm:$0xff] }
  0x37   :  { %345 = vmatprep.subr.bf16.mxu0 %v485_v0  ;;  %307 = vmatprep.mubr.msk.f32.mxu0 %vm486_vm0, %v487_v1  ;;  %v67_v3 = vld [vmem:[#allocation6 + $0x8] sm:$0xff]  ;;  %v68_v4 = vld [vmem:[#allocation6 + $0x10] sm:$0xff]  ;;  %v69_v6 = vld [vmem:[#allocation6 + $0x18] sm:$0xff]  ;;  %vm77_vm1 = vcmask 261120   ;;  %s488_s7 = smov [#allocation9]  }
  0x38   :  { %351 = vmatprep.subr.bf16.mxu1 %v485_v0  ;;  %342 = vmatprep.mubr.msk.f32.mxu1 %vm486_vm0, %v487_v1  ;;  %v346_v5 = vpack.c.bf16 %v67_v3, %v66_v2  ;;  %v157_v7 = vld [vmem:[#allocation8] sm:$0xff]  ;;  %v158_v8 = vld [vmem:[#allocation8 + $0x8] sm:$0xff]  ;;  %v159_v9 = vld [vmem:[#allocation8 + $0x10] sm:$0xff]  ;;  %v349_v11 = vpack.c.bf16 %v69_v6, %v68_v4  ;;  %s264_s8 = sshll.u32 %s488_s7, 4  ;;  %s265_s8 = int_to_ptr.vmem [resolvable:$true] %s264_s8 }
  0x39   :  { %v160_v10 = vld [vmem:[#allocation8 + $0x18] sm:$0xff]  ;;  %v352_v12 = vpack.c.bf16 %v158_v8, %v157_v7  ;;  %v161_v14 = vld [vmem:[#allocation8 + $0x20] sm:$0xff]  ;;  %v162_v15 = vld [vmem:[#allocation8 + $0x28] sm:$0xff]  ;;  %p457_p11 = scmp.lt.s32.totalorder %s265_s8, %s265_s8 }
  0x3a   :  { %347 = vmatpush3.bf16.msra.mxu0 %v346_v5  ;;  %v355_v13 = vpack.c.bf16 %v160_v10, %v159_v9  ;;  %v65_v16 = vld [vmem:[#allocation3] sm:$0xff]  ;;  %v358_v17 = vpack.c.bf16 %v162_v15, %v161_v14  ;;  %v163_v18 = vld [vmem:[#allocation8 + $0x30] sm:$0xff]  ;;  %v165_v21 = vld [vmem:[#allocation8 + $0x40] sm:$0xff] }
  0x3b   :  { %348 = vmatprep.subr.bf16.mxu0 %v485_v0  ;;  %353 = vmatpush3.bf16.msra.mxu1 %v352_v12  ;;  %v164_v19 = vld [vmem:[#allocation8 + $0x38] sm:$0xff]  ;;  %v166_v22 = vld [vmem:[#allocation8 + $0x48] sm:$0xff]  ;;  %v167_v24 = vld [vmem:[#allocation8 + $0x50] sm:$0xff] }
  0x3c   :  { %354 = vmatprep.subr.bf16.mxu1 %v485_v0  ;;  %v361_v20 = vpack.c.bf16 %v164_v19, %v163_v18  ;;  %v364_v23 = vpack.c.bf16 %v166_v22, %v165_v21  ;;  %v168_v25 = vld [vmem:[#allocation8 + $0x58] sm:$0xff]  ;;  %v169_v27 = vld [vmem:[#allocation8 + $0x60] sm:$0xff]  ;;  %v170_v28 = vld [vmem:[#allocation8 + $0x68] sm:$0xff] }
  0x3d   :  { %v367_v26 = vpack.c.bf16 %v168_v25, %v167_v24  ;;  %v370_v29 = vpack.c.bf16 %v170_v28, %v169_v27  ;;  %v171_v30 = vld [vmem:[#allocation8 + $0x70] sm:$0xff]  ;;  %v172_v31 = vld [vmem:[#allocation8 + $0x78] sm:$0xff] }
  0x3e   :  { %350 = vmatpush3.bf16.msra.mxu0 %v349_v11  ;;  %v373_v32 = vpack.c.bf16 %v172_v31, %v171_v30  ;;  %v274_v33 = vld [vmem:[%s581_s2] ss:$0 sm:$0xff]  ;;  %s452_s2 = scalar_lea.vmem %s265_s8, 128 }
  0x3f   :  { %356 = vmatpush3.bf16.msra.mxu1 %v355_v13  ;;  %v276_v42 = vld [vmem:[%s583_s4] ss:$0 sm:$0xff]  ;;  %p453_p10 = scmp.ne.s32.totalorder %s265_s8, %s452_s2  ;;  %p458_p12 = scmp.lt.s32.totalorder %s452_s2, %s452_s2 }
  0x40   :  { %357 = vmatprep.subr.bf16.mxu1 %v485_v0 }
  0x41   :  { %308 = vmatmul.mubr.msk.f32.vlgmr.msra.gmra.mrb[0].mxu0 %vm77_vm1, %v65_v16  ;;  %p459_p13 = por %p458_p12, %p457_p11 }
  0x43   :  { %359 = vmatpush3.bf16.msra.mxu1 %v358_v17  ;;  %p460_p0 = pnand %p459_p13, %p453_p10 }
  0x44   :  { %360 = vmatprep.subr.bf16.mxu1 %v485_v0 }
  0x47   :  { %362 = vmatpush3.bf16.msra.mxu1 %v361_v20 }
  0x48   :  { %363 = vmatprep.subr.bf16.mxu1 %v485_v0 }
  0x4b   :  { %365 = vmatpush3.bf16.msra.mxu1 %v364_v23 }
  0x4c   :  { %366 = vmatprep.subr.bf16.mxu1 %v485_v0 }
  0x4f   :  { %368 = vmatpush3.bf16.msra.mxu1 %v367_v26 }
  0x50   :  { %369 = vmatprep.subr.bf16.mxu1 %v485_v0 }
  0x53   :  { %371 = vmatpush3.bf16.msra.mxu1 %v370_v29 }
  0x54   :  { %372 = vmatprep.subr.bf16.mxu1 %v485_v0 }
  0x57   :  { %374 = vmatpush3.bf16.msra.mxu1 %v373_v32 }
 0x114   :  { %v147_v34 = vpop.f32.mrb[0].mxu0 }
 0x115   :  { %v148_v35 = vadd.f32 %v274_v33, %v147_v34  ;;  %v309_v36 = vpop.f32.mrb[1].mxu0 }
 0x117   :  { %v152_v37 = vmul.f32 0.70710677, %v148_v35  ;;  %v151_v39 = vmul.f32 0.5, %v148_v35 }
 0x119   :  { %384 = verf.f32 %v152_v37 }
 0x123   :  { %v385_v38 = vpop.eup %384 }
 0x124   :  { %v154_v40 = vadd.f32 1.0, %v385_v38 }
 0x126   :  { %v155_v41 = vmul.f32 %v154_v40, %v151_v39 }
 0x128   :  { %343 = vmatmul.mubr.f32.vlgmr.msra.gmra.mrb[0].mxu1 %v155_v41 }
 0x1fb   :  { %v239_v43 = vpop.f32.mrb[0].mxu1 }
 0x1fc   :  { %v256_v44 = vadd.f32 %v276_v42, %v239_v43  ;;  %v344_v45 = vpop.f32.mrb[1].mxu1 }
 0x1fe   :  { %257 = vst [vmem:[#allocation9] sm:$0xff] %v256_v44 }
 0x1ff   :  { %463 = shalt.err (!%p460_p0)
}
 0x200   :  { %s464_s11 = scalar_lea.hbm %s584_s5, 128 }
 0x201   :  { %p465_p1 = scmp.ne.s32.totalorder %s584_s5, %s464_s11  ;;  %p468_p2 = scmp.lt.u32.totalorder %s464_s11, %s584_s5 }
 0x203   :  { %p470_p3 = pnand %p468_p2, %p465_p1 }
 0x205   :  { %473 = shalt.err (!%p470_p3)
}
 0x206   :  { %267 = dma.vmem_to_hbm [thread:$0]  %s265_s8, 128, %s584_s5, [#allocation5]  }
 0x207   :  { %478 = dma.done.wait [#allocation5], 128  }
 0x208   :  { %479 = vsyncadd [#allocation5], 4294967168 }
 0x209   :  { %271 = vsyncpa [#allocation4], 1 }
 0x20a   :  { %272 = vsyncpa [#allocation7], 1 }
 0x20b   :  { %273 = vsyncpa [#allocation5], 1 }

// kernel: tpu_custom_call.1
= control target key start
LH: loop header
LB: loop body
LE: loop exit
PB: predicated region body
PF: predicated region fallthrough
CT: control target
= control target key end

     0   :  { %10 = vsyncpa [#allocation4], 0  ;;  %s579_s0 = inlined_call_operand.hbm [shape: f32[8,32], index: 0, kind: input, shape index: {}]   ;;  %s580_s1 = inlined_call_operand.hbm [shape: f32[32,128], index: 1, kind: input, shape index: {}]   ;;  %s581_s2 = inlined_call_operand.vmem [shape: f32[1,128], index: 2, kind: input, shape index: {}]   ;;  %s582_s3 = inlined_call_operand.hbm [shape: f32[128,128], index: 3, kind: input, shape index: {}]   ;;  %s583_s4 = inlined_call_operand.vmem [shape: f32[1,128], index: 4, kind: input, shape index: {}]   ;;  %s584_s5 = inlined_call_operand.hbm [shape: f32[8,128], index: 5, kind: output, shape index: {}]  }
   0x1   :  { %11 = vsyncpa [#allocation7], 0 }
   0x2   :  { %12 = vsyncpa [#allocation5], 0  ;;  %s480_s18 = smov [#allocation6]   ;;  %s386_s22 = scalar_lea.hbm %s580_s1, 512 }
   0x3   :  { %s28_s19 = sshll.u32 %s480_s18, 4  ;;  %p387_p0 = scmp.ne.s32.totalorder %s580_s1, %s386_s22  ;;  %s29_s19 = int_to_ptr.vmem [resolvable:$true] %s28_s19 }
   0x4   :  { %p390_p1 = scmp.lt.u32.totalorder %s386_s22, %s580_s1 }
   0x6   :  { %p392_p2 = pnand %p390_p1, %p387_p0 }
   0x8   :  { %395 = shalt.err (!%p392_p2)
}
   0x9   :  { %s396_s27 = scalar_lea.vmem %s29_s19, 512  ;;  %p401_p4 = scmp.lt.s32.totalorder %s29_s19, %s29_s19 }
   0xa   :  { %p397_p3 = scmp.ne.s32.totalorder %s29_s19, %s396_s27  ;;  %p402_p5 = scmp.lt.s32.totalorder %s396_s27, %s396_s27 }
   0xc   :  { %p403_p6 = por %p402_p5, %p401_p4 }
   0xe   :  { %p404_p7 = pnand %p403_p6, %p397_p3 }
  0x10   :  { %407 = shalt.err (!%p404_p7)
}
  0x11   :  { %s481_s28 = smov 128   ;;  %s482_s29 = smov 8  }
  0x12   :  { %34 = dma.hbm_to_vmem [thread:$0]  %s580_s1, 512, %s29_s19, [#allocation7], %s481_s28, %s481_s28, %s482_s29  }
  0x13   :  { %s483_s7 = smov [#allocation3]   ;;  %s484_s9 = smov [#allocation8]  }
  0x14   :  { %s19_s8 = sshll.u32 %s483_s7, 4  ;;  %s42_s10 = sshll.u32 %s484_s9, 4  ;;  %s20_s8 = int_to_ptr.vmem [resolvable:$true] %s19_s8  ;;  %s43_s10 = int_to_ptr.vmem [resolvable:$true] %s42_s10 }
  0x15   :  { %s408_s13 = scalar_lea.hbm %s579_s0, 128 }
  0x16   :  { %p409_p8 = scmp.ne.s32.totalorder %s579_s0, %s408_s13  ;;  %p412_p9 = scmp.lt.u32.totalorder %s408_s13, %s579_s0 }
  0x18   :  { %p414_p10 = pnand %p412_p9, %p409_p8 }
  0x1a   :  { %417 = shalt.err (!%p414_p10)
}
  0x1b   :  { %s418_s1 = scalar_lea.vmem %s20_s8, 128  ;;  %p423_p12 = scmp.lt.s32.totalorder %s20_s8, %s20_s8 }
  0x1c   :  { %p419_p11 = scmp.ne.s32.totalorder %s20_s8, %s418_s1  ;;  %p424_p13 = scmp.lt.s32.totalorder %s418_s1, %s418_s1 }
  0x1e   :  { %p425_p0 = por %p424_p13, %p423_p12 }
  0x20   :  { %p426_p1 = pnand %p425_p0, %p419_p11 }
  0x22   :  { %429 = shalt.err (!%p426_p1)
}
  0x23   :  { %22 = dma.hbm_to_vmem [thread:$0]  %s579_s0, 128, %s20_s8, [#allocation4]  }
  0x24   :  { %s430_s22 = scalar_lea.hbm %s582_s3, 2048 }
  0x25   :  { %p431_p2 = scmp.ne.s32.totalorder %s582_s3, %s430_s22  ;;  %p434_p3 = scmp.lt.u32.totalorder %s430_s22, %s582_s3 }
  0x27   :  { %p436_p4 = pnand %p434_p3, %p431_p2 }
  0x29   :  { %439 = shalt.err (!%p436_p4)
}
  0x2a   :  { %s440_s27 = scalar_lea.vmem %s43_s10, 2048  ;;  %p445_p6 = scmp.lt.s32.totalorder %s43_s10, %s43_s10 }
  0x2b   :  { %p441_p5 = scmp.ne.s32.totalorder %s43_s10, %s440_s27  ;;  %p446_p7 = scmp.lt.s32.totalorder %s440_s27, %s440_s27 }
  0x2d   :  { %p447_p8 = por %p446_p7, %p445_p6 }
  0x2f   :  { %p448_p9 = pnand %p447_p8, %p441_p5 }
  0x31   :  { %451 = shalt.err (!%p448_p9)
}
  0x32   :  { %48 = dma.hbm_to_vmem [thread:$0]  %s582_s3, 2048, %s43_s10, [#allocation7], %s481_s28, %s481_s28, %s482_s29  }
  0x33   :  { %474 = dma.done.wait [#allocation4], 128  }
  0x34   :  { %475 = vsyncadd [#allocation4], 4294967168 }
  0x35   :  { %476 = dma.done.wait [#allocation7], 2560  }
  0x36   :  { %477 = vsyncadd [#allocation7], 4294964736  ;;  %v485_v0 = vmov 0.0|0.0   ;;  %vm486_vm0 = vmmov 0   ;;  %v487_v1 = vmov 0.0   ;;  %v66_v2 = vld [vmem:[#allocation6] sm:$0xff] }
  0x37   :  { %345 = vmatprep.subr.bf16.mxu0 %v485_v0  ;;  %307 = vmatprep.mubr.msk.f32.mxu0 %vm486_vm0, %v487_v1  ;;  %v67_v3 = vld [vmem:[#allocation6 + $0x8] sm:$0xff]  ;;  %v68_v4 = vld [vmem:[#allocation6 + $0x10] sm:$0xff]  ;;  %v69_v6 = vld [vmem:[#allocation6 + $0x18] sm:$0xff]  ;;  %vm77_vm1 = vcmask 261120   ;;  %s488_s7 = smov [#allocation9]  }
  0x38   :  { %351 = vmatprep.subr.bf16.mxu1 %v485_v0  ;;  %342 = vmatprep.mubr.msk.f32.mxu1 %vm486_vm0, %v487_v1  ;;  %v346_v5 = vpack.c.bf16 %v67_v3, %v66_v2  ;;  %v157_v7 = vld [vmem:[#allocation8] sm:$0xff]  ;;  %v158_v8 = vld [vmem:[#allocation8 + $0x8] sm:$0xff]  ;;  %v159_v9 = vld [vmem:[#allocation8 + $0x10] sm:$0xff]  ;;  %v349_v11 = vpack.c.bf16 %v69_v6, %v68_v4  ;;  %s264_s8 = sshll.u32 %s488_s7, 4  ;;  %s265_s8 = int_to_ptr.vmem [resolvable:$true] %s264_s8 }
  0x39   :  { %v160_v10 = vld [vmem:[#allocation8 + $0x18] sm:$0xff]  ;;  %v352_v12 = vpack.c.bf16 %v158_v8, %v157_v7  ;;  %v161_v14 = vld [vmem:[#allocation8 + $0x20] sm:$0xff]  ;;  %v162_v15 = vld [vmem:[#allocation8 + $0x28] sm:$0xff]  ;;  %p457_p11 = scmp.lt.s32.totalorder %s265_s8, %s265_s8 }
  0x3a   :  { %347 = vmatpush3.bf16.msra.mxu0 %v346_v5  ;;  %v355_v13 = vpack.c.bf16 %v160_v10, %v159_v9  ;;  %v65_v16 = vld [vmem:[#allocation3] sm:$0xff]  ;;  %v358_v17 = vpack.c.bf16 %v162_v15, %v161_v14  ;;  %v163_v18 = vld [vmem:[#allocation8 + $0x30] sm:$0xff]  ;;  %v165_v21 = vld [vmem:[#allocation8 + $0x40] sm:$0xff] }
  0x3b   :  { %348 = vmatprep.subr.bf16.mxu0 %v485_v0  ;;  %353 = vmatpush3.bf16.msra.mxu1 %v352_v12  ;;  %v164_v19 = vld [vmem:[#allocation8 + $0x38] sm:$0xff]  ;;  %v166_v22 = vld [vmem:[#allocation8 + $0x48] sm:$0xff]  ;;  %v167_v24 = vld [vmem:[#allocation8 + $0x50] sm:$0xff] }
  0x3c   :  { %354 = vmatprep.subr.bf16.mxu1 %v485_v0  ;;  %v361_v20 = vpack.c.bf16 %v164_v19, %v163_v18  ;;  %v364_v23 = vpack.c.bf16 %v166_v22, %v165_v21  ;;  %v168_v25 = vld [vmem:[#allocation8 + $0x58] sm:$0xff]  ;;  %v169_v27 = vld [vmem:[#allocation8 + $0x60] sm:$0xff]  ;;  %v170_v28 = vld [vmem:[#allocation8 + $0x68] sm:$0xff] }
  0x3d   :  { %v367_v26 = vpack.c.bf16 %v168_v25, %v167_v24  ;;  %v370_v29 = vpack.c.bf16 %v170_v28, %v169_v27  ;;  %v171_v30 = vld [vmem:[#allocation8 + $0x70] sm:$0xff]  ;;  %v172_v31 = vld [vmem:[#allocation8 + $0x78] sm:$0xff] }
  0x3e   :  { %350 = vmatpush3.bf16.msra.mxu0 %v349_v11  ;;  %v373_v32 = vpack.c.bf16 %v172_v31, %v171_v30  ;;  %v274_v33 = vld [vmem:[%s581_s2] ss:$0 sm:$0xff]  ;;  %s452_s2 = scalar_lea.vmem %s265_s8, 128 }
  0x3f   :  { %356 = vmatpush3.bf16.msra.mxu1 %v355_v13  ;;  %v276_v42 = vld [vmem:[%s583_s4] ss:$0 sm:$0xff]  ;;  %p453_p10 = scmp.ne.s32.totalorder %s265_s8, %s452_s2  ;;  %p458_p12 = scmp.lt.s32.totalorder %s452_s2, %s452_s2 }
  0x40   :  { %357 = vmatprep.subr.bf16.mxu1 %v485_v0 }
  0x41   :  { %308 = vmatmul.mubr.msk.f32.vlgmr.msra.gmra.mrb[0].mxu0 %vm77_vm1, %v65_v16  ;;  %p459_p13 = por %p458_p12, %p457_p11 }
  0x43   :  { %359 = vmatpush3.bf16.msra.mxu1 %v358_v17  ;;  %p460_p0 = pnand %p459_p13, %p453_p10 }
  0x44   :  { %360 = vmatprep.subr.bf16.mxu1 %v485_v0 }
  0x47   :  { %362 = vmatpush3.bf16.msra.mxu1 %v361_v20 }
  0x48   :  { %363 = vmatprep.subr.bf16.mxu1 %v485_v0 }
  0x4b   :  { %365 = vmatpush3.bf16.msra.mxu1 %v364_v23 }
  0x4c   :  { %366 = vmatprep.subr.bf16.mxu1 %v485_v0 }
  0x4f   :  { %368 = vmatpush3.bf16.msra.mxu1 %v367_v26 }
  0x50   :  { %369 = vmatprep.subr.bf16.mxu1 %v485_v0 }
  0x53   :  { %371 = vmatpush3.bf16.msra.mxu1 %v370_v29 }
  0x54   :  { %372 = vmatprep.subr.bf16.mxu1 %v485_v0 }
  0x57   :  { %374 = vmatpush3.bf16.msra.mxu1 %v373_v32 }
 0x114   :  { %v147_v34 = vpop.f32.mrb[0].mxu0 }
 0x115   :  { %v148_v35 = vadd.f32 %v274_v33, %v147_v34  ;;  %v309_v36 = vpop.f32.mrb[1].mxu0 }
 0x117   :  { %v152_v37 = vmul.f32 0.70710677, %v148_v35  ;;  %v151_v39 = vmul.f32 0.5, %v148_v35 }
 0x119   :  { %384 = verf.f32 %v152_v37 }
 0x123   :  { %v385_v38 = vpop.eup %384 }
 0x124   :  { %v154_v40 = vadd.f32 1.0, %v385_v38 }
 0x126   :  { %v155_v41 = vmul.f32 %v154_v40, %v151_v39 }
 0x128   :  { %343 = vmatmul.mubr.f32.vlgmr.msra.gmra.mrb[0].mxu1 %v155_v41 }
 0x1fb   :  { %v239_v43 = vpop.f32.mrb[0].mxu1 }
 0x1fc   :  { %v256_v44 = vadd.f32 %v276_v42, %v239_v43  ;;  %v344_v45 = vpop.f32.mrb[1].mxu1 }
 0x1fe   :  { %257 = vst [vmem:[#allocation9] sm:$0xff] %v256_v44 }
 0x1ff   :  { %463 = shalt.err (!%p460_p0)
}
 0x200   :  { %s464_s11 = scalar_lea.hbm %s584_s5, 128 }
 0x201   :  { %p465_p1 = scmp.ne.s32.totalorder %s584_s5, %s464_s11  ;;  %p468_p2 = scmp.lt.u32.totalorder %s464_s11, %s584_s5 }
 0x203   :  { %p470_p3 = pnand %p468_p2, %p465_p1 }
 0x205   :  { %473 = shalt.err (!%p470_p3)
}
 0x206   :  { %267 = dma.vmem_to_hbm [thread:$0]  %s265_s8, 128, %s584_s5, [#allocation5]  }
 0x207   :  { %478 = dma.done.wait [#allocation5], 128  }
 0x208   :  { %479 = vsyncadd [#allocation5], 4294967168 }
 0x209   :  { %271 = vsyncpa [#allocation4], 1 }
 0x20a   :  { %272 = vsyncpa [#allocation7], 1 }
 0x20b   :  { %273 = vsyncpa [#allocation5], 1 }

</bundles_post_ra>
